<compile_context>
chip_gen: v6e
topology: v6e:2x2x1
jax: 0.10.0
libtpu: 0.0.40
codegen_flags: <defaults>
</compile_context>

<pallas_src>
import functools

import jax
import jax.numpy as jnp
from jax.experimental import pallas as pl
from jax.experimental.pallas import tpu as pltpu


def _round_up(x, m):
    return (x + m - 1) // m * m


def _vmem_capacity_bytes():
    try:
        cap = getattr(pltpu.get_tpu_info(), "vmem_capacity_bytes", None)
        if cap:
            return int(cap)
    except Exception:
        pass
    return 64 << 20  # conservative fallback (v7x physical size)


# ----------------------------------------------------------------------------
# Kernels
# ----------------------------------------------------------------------------
def _residual_ffn_kernel(x_ref, w_ref, b_ref, o_ref, *, half, matmul_dtype):
    # x_ref: (tm, D)   w_ref: (D, D) resident   b_ref: (1, D)
    x = x_ref[...]
    y = jnp.dot(x.astype(matmul_dtype), w_ref[...],
                preferred_element_type=jnp.float32)
    y = y + b_ref[...].astype(jnp.float32)
    if half:            # trace-time branch: no VPU multiply when half=False
        y = y * 0.5
    o_ref[...] = (y + x.astype(jnp.float32)).astype(o_ref.dtype)


def _residual_ffn_coltiled_kernel(x_ref, w_ref, b_ref, xres_ref, o_ref, *,
                                  half, matmul_dtype):
    # x_ref: (tm, D)  w_ref: (D, tn)  b_ref: (1, tn)  xres_ref: (tm, tn)
    x = x_ref[...]
    y = jnp.dot(x.astype(matmul_dtype), w_ref[...],
                preferred_element_type=jnp.float32)
    y = y + b_ref[...].astype(jnp.float32)
    if half:
        y = y * 0.5
    o_ref[...] = (y + xres_ref[...].astype(jnp.float32)).astype(o_ref.dtype)


# ----------------------------------------------------------------------------
# Wrapper
# ----------------------------------------------------------------------------
def residual_ffn(x, w, b, *, half=False, tm=None, tn=None,
                 matmul_dtype=jnp.bfloat16):
    """out = (x @ w + b) * (0.5 if half else 1.0) + x, fused in one kernel.

    x: (B, T, D)   w: (D, D) (pre-cast to `matmul_dtype` to avoid a per-call
    HBM copy)   b: (D,).  Pass matmul_dtype=jnp.float32 for fp32 parity.
    """
    B, T, D = x.shape
    M = B * T
    x2 = x.reshape(M, D)

    # Hoisted-cast friendly: no-op if the caller already pre-cast the weight.
    w_mm = w if w.dtype == matmul_dtype else w.astype(matmul_dtype)
    b2 = b.reshape(1, D).astype(jnp.float32)
    itemsize_mm = jnp.dtype(matmul_dtype).itemsize
    x_itemsize = jnp.dtype(x.dtype).itemsize

    vmem_budget = int(0.75 * _vmem_capacity_bytes())

    # --- D-aware row tile: keep fp32 x/out tiles in the multi-MiB range ----
    if tm is None:
        if D <= 256:
            tm = 2048
        elif D <= 512:
            tm = 1024
        elif D <= 2048:
            tm = 512
        else:
            tm = 256
    tm_eff = min(_round_up(tm, 8), _round_up(M, 8))
    # v7x has 2 TensorCores; the "parallel" row axis needs >= 2 steps.
    if pl.cdiv(M, tm_eff) < 2 and M > 8:
        tm_eff = _round_up(pl.cdiv(M, 2), 8)
    grid_m = pl.cdiv(M, tm_eff)

    # --- decide resident-weight vs. column-tiled weight ---------------------
    resident_bytes = (
        D * D * itemsize_mm                  # weight, single-buffered
        + 2 * 2 * tm_eff * D * x_itemsize    # x + out tiles, double-buffered
        + D * 4                              # bias
    )
    if tn is None and resident_bytes > vmem_budget:
        for cand in (512, 256, 128):
            if D % cand == 0:
                tn = cand
                break
        # TODO(synk): if D % 128 != 0 we stay resident (masked stores); add K
        # tiling for D so large that the (tm, D) fp32 x tile overflows VMEM.

    if tn is None:
        # ------------------ resident-weight path ---------------------------
        vmem_limit = max(min(resident_bytes + (8 << 20), vmem_budget), 16 << 20)
        kernel = functools.partial(_residual_ffn_kernel, half=half,
                                   matmul_dtype=matmul_dtype)
        out = pl.pallas_call(
            kernel,
            out_shape=jax.ShapeDtypeStruct((M, D), x.dtype),
            grid_spec=pltpu.PrefetchScalarGridSpec(
                num_scalar_prefetch=0,
                grid=(grid_m,),
                in_specs=[
                    pl.BlockSpec((tm_eff, D), lambda i: (i, 0)),
                    # Resident blocks: block index never changes -> 1 buffer.
                    pl.BlockSpec((D, D), lambda i: (0, 0),
                                 pipeline_mode=pl.Buffered(1)),
                    pl.BlockSpec((1, D), lambda i: (0, 0),
                                 pipeline_mode=pl.Buffered(1)),
                ],
                out_specs=pl.BlockSpec((tm_eff, D), lambda i: (i, 0)),
            ),
            compiler_params=pltpu.CompilerParams(
                dimension_semantics=("parallel",),
                vmem_limit_bytes=int(vmem_limit),
            ),
            cost_estimate=pl.CostEstimate(
                flops=2 * M * D * D,
                transcendentals=0,
                bytes_accessed=2 * M * D * x_itemsize
                + D * D * itemsize_mm + D * 4,
            ),
        )(x2, w_mm, b2)
    else:
        # ------------------ column (N) tiled weight path -------------------
        assert D % tn == 0 and tn % 128 == 0, "tn must be a 128-multiple dividing D"
        grid_n = D // tn
        needed = (
            2 * tm_eff * D * x_itemsize       # x tile (full K), double-buffered
            + 2 * tm_eff * tn * x_itemsize    # out tile
            + 2 * tm_eff * tn * x_itemsize    # residual x column tile
            + 2 * D * tn * itemsize_mm        # weight column tile
            + 2 * tn * 4                      # bias tile
        )
        vmem_limit = max(min(needed + (8 << 20), vmem_budget), 16 << 20)
        kernel = functools.partial(_residual_ffn_coltiled_kernel, half=half,
                                   matmul_dtype=matmul_dtype)
        out = pl.pallas_call(
            kernel,
            out_shape=jax.ShapeDtypeStruct((M, D), x.dtype),
            grid_spec=pltpu.PrefetchScalarGridSpec(
                num_scalar_prefetch=0,
                grid=(grid_m, grid_n),   # j (columns) innermost -> x reused
                in_specs=[
                    pl.BlockSpec((tm_eff, D), lambda i, j: (i, 0)),   # x (matmul)
                    pl.BlockSpec((D, tn), lambda i, j: (0, j)),       # weight cols
                    pl.BlockSpec((1, tn), lambda i, j: (0, j)),       # bias cols
                    pl.BlockSpec((tm_eff, tn), lambda i, j: (i, j)),  # x (residual)
                ],
                out_specs=pl.BlockSpec((tm_eff, tn), lambda i, j: (i, j)),
            ),
            compiler_params=pltpu.CompilerParams(
                dimension_semantics=("parallel", "parallel"),
                vmem_limit_bytes=int(vmem_limit),
            ),
            cost_estimate=pl.CostEstimate(
                flops=2 * M * D * D,
                transcendentals=0,
                bytes_accessed=2 * M * D * x_itemsize        # x (both reads) ~
                + grid_m * D * D * itemsize_mm               # weight, per row tile
                + M * D * x_itemsize,                        # output
            ),
        )(x2, w_mm, b2, x2)

    return out.reshape(B, T, D)


# ----------------------------------------------------------------------------
# Demo / correctness check
# ----------------------------------------------------------------------------
if __name__ == "__main__":
    key = jax.random.PRNGKey(0)
    kx, kw, kb, kx2, kw2, kb2 = jax.random.split(key, 6)

    # --- small shape, resident-weight path ---------------------------------
    B, T, D = 2, 8, 128
    x = jax.random.normal(kx, (B, T, D), dtype=jnp.float32)
    w = jax.random.normal(kw, (D, D), dtype=jnp.float32) * (1.0 / jnp.sqrt(D))
    b = jax.random.normal(kb, (D,), dtype=jnp.float32) * 0.01
    w_bf16 = w.astype(jnp.bfloat16)   # hoisted one-time cast (not per call)

    out_half = residual_ffn(x, w_bf16, b, half=True)     # net(x)*0.5 + x
    out_full = residual_ffn(x, w_bf16, b, half=False)    # net(x) + x
    out_f32 = residual_ffn(x, w, b, half=True, matmul_dtype=jnp.float32)

    # --- column-tiled path (the large-D branch, forced small for testing) --
    B2, T2, D2 = 2, 8, 256
    x_b = jax.random.normal(kx2, (B2, T2, D2), dtype=jnp.float32)
    w_b = (jax.random.normal(kw2, (D2, D2), dtype=jnp.float32)
           * (1.0 / jnp.sqrt(D2))).astype(jnp.bfloat16)
    b_b = jax.random.normal(kb2, (D2,), dtype=jnp.float32) * 0.01
    out_tiled = residual_ffn(x_b, w_b, b_b, half=True, tn=128)

    jax.block_until_ready((out_half, out_full, out_f32, out_tiled))

    # Plain-JAX references.
    y_ref = jnp.einsum("btd,de->bte", x, w) + b
    assert jnp.allclose(out_half, y_ref * 0.5 + x, atol=5e-2, rtol=5e-2)
    assert jnp.allclose(out_full, y_ref + x, atol=5e-2, rtol=5e-2)
    assert jnp.allclose(out_f32, y_ref * 0.5 + x, atol=2e-3, rtol=2e-3)

    y_ref_b = jnp.einsum("btd,de->bte", x_b, w_b.astype(jnp.float32)) + b_b
    assert jnp.allclose(out_tiled, y_ref_b * 0.5 + x_b, atol=5e-2, rtol=5e-2)

    print("KERNEL_OK")
</pallas_src>

<mosaic_0001>
module attributes {stable_mosaic.version = 11 : i64} {
  func.func @_residual_ffn_kernel(%arg0: i32, %arg1: memref<8x128xf32, #tpu.memory_space<vmem>>, %arg2: memref<128x128xbf16, #tpu.memory_space<vmem>>, %arg3: memref<1x128xf32, #tpu.memory_space<vmem>>, %arg4: memref<8x128xf32, #tpu.memory_space<vmem>>) attributes {dimension_semantics = [#tpu.dimension_semantics<parallel>], iteration_bounds = array<i64: 2>, scalar_prefetch = 0 : i64, scratch_operands = 0 : i64, tpu.core_type = #tpu.core_type<tc>, window_params = [{transform_indices = @transform_0, window_bounds = array<i64: 8, 128>}, {pipeline_mode = #tpu.pipeline_mode<synchronous>, transform_indices = @transform_1, window_bounds = array<i64: 128, 128>}, {pipeline_mode = #tpu.pipeline_mode<synchronous>, transform_indices = @transform_2, window_bounds = array<i64: 1, 128>}, {transform_indices = @transform_3, window_bounds = array<i64: 8, 128>}]} {
    %c0 = arith.constant 0 : index
    %c0_0 = arith.constant 0 : index
    %0 = vector.load %arg1[%c0, %c0_0] : memref<8x128xf32, #tpu.memory_space<vmem>>, vector<8x128xf32>
    %1 = arith.truncf %0 : vector<8x128xf32> to vector<8x128xbf16>
    %c0_1 = arith.constant 0 : index
    %c0_2 = arith.constant 0 : index
    %2 = vector.load %arg2[%c0_1, %c0_2] : memref<128x128xbf16, #tpu.memory_space<vmem>>, vector<128x128xbf16>
    %cst = arith.constant dense<0.000000e+00> : vector<8x128xf32>
    %3 = tpu.matmul %1, %2, %cst {dimension_numbers = #tpu.dot_dimension_numbers<[1], [0], [0], [1], [0, 0, 1, 1], [], []>} : vector<8x128xbf16>, vector<128x128xbf16>, vector<8x128xf32> -> vector<8x128xf32>
    %c0_3 = arith.constant 0 : index
    %c0_4 = arith.constant 0 : index
    %4 = vector.load %arg3[%c0_3, %c0_4] : memref<1x128xf32, #tpu.memory_space<vmem>>, vector<1x128xf32>
    %5 = vector.broadcast %4 : vector<1x128xf32> to vector<8x128xf32>
    %6 = arith.addf %3, %5 : vector<8x128xf32>
    %cst_5 = arith.constant 5.000000e-01 : f32
    %7 = vector.broadcast %cst_5 : f32 to vector<8x128xf32>
    %8 = arith.mulf %6, %7 : vector<8x128xf32>
    %9 = arith.addf %8, %0 : vector<8x128xf32>
    %c0_6 = arith.constant 0 : index
    %c0_7 = arith.constant 0 : index
    %10 = vector.load %arg4[%c0_6, %c0_7] : memref<8x128xf32, #tpu.memory_space<vmem>>, vector<8x128xf32>
    tpu.vector_store %arg4[%c0_6, %c0_7], %9 {strides = array<i32>} : memref<8x128xf32, #tpu.memory_space<vmem>>, vector<8x128xf32>,
    return
  }
  func.func @transform_0(%arg0: i32) -> (i32, i32) {
    %c0_i32 = arith.constant 0 : i32
    %c0_i32_0 = arith.constant 0 : i32
    return %arg0, %c0_i32 : i32, i32
  }
  func.func @transform_1(%arg0: i32) -> (i32, i32) {
    %c0_i32 = arith.constant 0 : i32
    %c0_i32_0 = arith.constant 0 : i32
    %c0_i32_1 = arith.constant 0 : i32
    return %c0_i32, %c0_i32_0 : i32, i32
  }
  func.func @transform_2(%arg0: i32) -> (i32, i32) {
    %c0_i32 = arith.constant 0 : i32
    %c0_i32_0 = arith.constant 0 : i32
    %c0_i32_1 = arith.constant 0 : i32
    return %c0_i32, %c0_i32_0 : i32, i32
  }
  func.func @transform_3(%arg0: i32) -> (i32, i32) {
    %c0_i32 = arith.constant 0 : i32
    %c0_i32_0 = arith.constant 0 : i32
    return %arg0, %c0_i32 : i32, i32
  }
}

</mosaic_0001>

<bundles_post_ra>
// kernel: tpu_custom_call.1
= control target key start
LH: loop header
LB: loop body
LE: loop exit
PB: predicated region body
PF: predicated region fallthrough
CT: control target
= control target key end

     0   :  { %8 = vsyncpa [#allocation3], 0  ;;  %s851_s0 = inlined_call_operand.hbm [shape: f32[16,128], index: 0, kind: input, shape index: {}]   ;;  %s852_s1 = inlined_call_operand.hbm [shape: bf16[128,128], index: 1, kind: input, shape index: {}]   ;;  %s853_s2 = inlined_call_operand.vmem [shape: f32[1,128], index: 2, kind: input, shape index: {}]   ;;  %s854_s3 = inlined_call_operand.hbm [shape: f32[16,128], index: 3, kind: output, shape index: {}]  }
   0x1   :  { %10 = vsyncpa [#allocation3 + $0x1], 0 }
   0x2   :  { %11 = vsyncpa [#allocation6], 0 }
   0x3   :  { %12 = vsyncpa [#allocation4], 0 }
   0x4   :  { %14 = vsyncpa [#allocation4 + $0x1], 0  ;;  %s684_s12 = smov 0   ;;  %s686_s13 = smov 0  }
   0x5   :  { %s688_s14 = smov 0   ;;  %s690_s15 = smov 0  }
   0x6 LB: > { %s705_s16 = sadd.s32 4294967295, %s655_s15   ;;  %s412_s17 = sadd.s32 4294967294, %s655_s15   ;;  %s655_s15 = sphi %s690_s15, %s876_s15   ;;  %s651_s14 = sphi %s688_s14, %s875_s14   ;;  %s647_s13 = sphi %s686_s13, %s874_s13   ;;  %s643_s12 = sphi %s684_s12, %s873_s12  }
   0x7   : > { %p40_p0 = scmp.ne.s32.totalorder %s647_s13, %s643_s12  ;;  %p855_p1 = scmp.eq.s32.totalorder %s705_s16, 0 }
   0x8   : > { %p112_p3 = scmp.eq.s32.totalorder %s412_s17, 1  ;;  %p413_p5 = scmp.ge.s32.totalorder %s655_s15, 1 }
   0x9   : > { %p714_p4 = por %p855_p1, %p40_p0  ;;  %p119_p7 = scmp.lt.s32.totalorder %s655_s15, 3 }
   0xa   : > { %p719_p6 = por %p112_p3, %p40_p0  ;;  %s657_s21 = smov [#allocation5]  }
   0xb   : > { %s859_s18 = scalar_select %p714_p4, 1, 0 }
   0xc   : > { %s860_s19 = scalar_select %p719_p6, 1, 0 }
   0xd   : > { %p724_p8 = pnand %p413_p5, %p119_p7  ;;  %s131_s22 = sshll.u32 %s657_s21, 4  ;;  %s132_s22 = int_to_ptr.vmem [resolvable:$true] %s131_s22 }
   0xe   : > { %s738_s24 = sadd.s32 1, %s655_s15   ;;  %s27_s25 = sadd.s32 1, %s651_s14 }
   0xf   : > { %s861_s20 = scalar_select %p724_p8, 1, 0 }
  0x10   : > { %p472_p9 = pneg %p724_p8  ;;  %s24_s26 = ssub.s32 %s655_s15, %s738_s24 }
  0x11   : > { %s544_s27 = scalar_lea.vmem %s132_s22, 1024  ;;  %p552_p5 = scmp.lt.s32.totalorder %s132_s22, %s132_s22 }
  0x12   : > { %p733_p11 = pnand %p472_p9, %p855_p1  ;;  %p545_p13 = scmp.ne.s32.totalorder %s132_s22, %s544_s27 }
  0x13   : > { %p553_p7 = scmp.lt.s32.totalorder %s544_s27, %s544_s27 }
  0x14   : > { %p535_p12 = pneg %p733_p11 }
  0x15   : > { %p554_p10 = por %p553_p7, %p552_p5 }
  0x16   : > { %p547_p0 = pnand %p545_p13, %p535_p12 }
  0x18   : > { %p548_p3 = pneg %p547_p0 }
  0x1a   : > { %p555_p2 = pnand %p554_p10, %p548_p3 }
  0x1c   : > { %558 = shalt.err (!%p555_p2)
}
  0x1d   : > { %s658_s28 = smov 64   ;;  %s659_s29 = smov 4  }
  0x1e   : > { %475 = dma.hbm_to_vmem [thread:$0]  (!%p733_p11), %s852_s1, 1024, %s132_s22, [#allocation6], %s658_s28, %s658_s28, %s659_s29  }
  0x1f   : > { %p25_p9 = scmp.eq.s32.totalorder %s24_s26, 0  ;;  %p34_p12 = scmp.ne.s32.totalorder %s651_s14, %s647_s13 }
  0x20   : > { %p35_p10 = scmp.eq.s32.totalorder %s655_s15, 0  ;;  %p485_p2 = scmp.lt.s32.totalorder %s655_s15, 2 }
  0x21   : > { %s755_s5 = scalar_select %p25_p9, %s651_s14, %s27_s25  }
  0x22   : > { %p36_p13 = por %p35_p10, %p34_p12  ;;  %p863_p0 = scmp.eq.s32.totalorder %s705_s16, 1 }
  0x23   : > { %s148_s7 = sand.u32 1, %s651_s14   ;;  %s417_s8 = sshll.u32 %s655_s15, 7 }
  0x24   : > { %p759_p3 = por %p863_p0, %p34_p12  ;;  %s416_s9 = sshll.u32 %s148_s7, 3 }
  0x25   : > { %s768_s17 = scalar_lea.hbm %s851_s0, %s417_s8  ;;  %s152_s21 = scalar_lea.vmem [#allocation2], %s416_s9 }
  0x26   : > { %s864_s6 = scalar_select %p759_p3, 1, 0 }
  0x27   : > { %s159_s22 = sshll.u32 %s152_s21, 4  ;;  %p770_p11 = pnand %p485_p2, %p36_p13  ;;  %s160_s22 = int_to_ptr.vmem [resolvable:$true] %s159_s22 }
  0x28   : > { %s149_s25 = scalar_lea.sflag [#allocation3], %s148_s7  ;;  %s559_s26 = scalar_lea.hbm %s768_s17, 128 }
  0x29   : > { %p560_p5 = scmp.ne.s32.totalorder %s768_s17, %s559_s26  ;;  %p561_p7 = pneg %p770_p11 }
  0x2a   : > { %s564_s29 = scalar_lea.hbm %s851_s0, 256  ;;  %p565_p10 = scmp.lt.s32.totalorder %s768_s17, %s851_s0 }
  0x2b   : > { %p562_p9 = pnand %p561_p7, %p560_p5  ;;  %p566_p2 = scmp.lt.s32.totalorder %s564_s29, %s559_s26 }
  0x2d   : > { %p563_p12 = pneg %p562_p9  ;;  %p567_p13 = por %p566_p2, %p565_p10 }
  0x2f   : > { %p568_p0 = pnand %p567_p13, %p563_p12 }
  0x31   : > { %571 = shalt.err (!%p568_p0)
}
  0x32   : > { %s572_s8 = scalar_lea.vmem %s160_s22, 128  ;;  %s660_s7 = smov [#allocation2]  }
  0x33   : > { %p573_p1 = scmp.ne.s32.totalorder %s160_s22, %s572_s8  ;;  %s577_s9 = sshll.u32 %s660_s7, 4  ;;  %s578_s9 = int_to_ptr.vmem [resolvable:$false] %s577_s9 }
  0x34   : > { %s579_s10 = scalar_lea.vmem %s578_s9, 256  ;;  %p580_p5 = scmp.lt.s32.totalorder %s160_s22, %s578_s9 }
  0x35   : > { %p575_p6 = pnand %p573_p1, %p561_p7  ;;  %p581_p9 = scmp.lt.s32.totalorder %s579_s10, %s572_s8 }
  0x37   : > { %p576_p3 = pneg %p575_p6  ;;  %p582_p4 = por %p581_p9, %p580_p5 }
  0x39   : > { %p583_p8 = pnand %p582_p4, %p576_p3 }
  0x3b   : > { %586 = shalt.err (!%p583_p8)
}
  0x3c   : > { %479 = dma.hbm_to_vmem [thread:$0]  (!%p770_p11), %s768_s17, 128, %s160_s22, %s149_s25  }
  0x3d   : > { %p866_p12 = scmp.ne.s32.totalorder %s861_s20, 0 }
  0x3e   : > { %s791_s11 = sand.u32 (!%p866_p12), 1, %s647_s13   ;;  %p867_p1 = scmp.ne.s32.totalorder (!%p866_p12), %s859_s18, 0 }
  0x3f   : > { %168 = sbr.rel (%p866_p12) target bundleno = 317 (0x13d), region = 32  ;;  %s419_s21 = sshll.u32 (!%p866_p12), %s791_s11, 3 }
  0x40   : > { %s171_s26 = scalar_lea.sflag (!%p866_p12), [#allocation3], %s791_s11  ;;  %s174_s27 = scalar_lea.vmem (!%p866_p12), [#allocation2], %s419_s21 }
  0x44   : > { %630 = dma.done.wait (%p867_p1), %s171_s26, 128  }
  0x45   : > { %632 = vsyncadd (%p867_p1), %s171_s26, 4294967168  ;;  %p868_p4 = scmp.eq.s32.totalorder %s705_s16, 0 }
  0x47   : > { %634 = dma.done.wait (%p868_p4), [#allocation6], 1024   ;;  %p869_p6 = pmov %p868_p4 }
  0x48   : > { %v661_v0 = vmov 0.0   ;;  %vm662_vm0 = vmmov 0   ;;  %v525_v1 = vld [vmem:[#allocation5 + $0x38] sm:$0xff]   ;;  %v526_v2 = vld [vmem:[#allocation5 + $0x30] sm:$0xff]   ;;  %v527_v3 = vld [vmem:[#allocation5 + $0x28] sm:$0xff]   ;;  %s432_s17 = sshll.u32 %s705_s16, 7 }
  0x49   : > { %636 = vsyncadd (%p869_p6), [#allocation6], 4294966272  ;;  %444 = vmatprep.subr.bf16.mxu0 %v661_v0  ;;  %460 = vmatprep.mubr.msk.bf16.mxu0 %vm662_vm0, %v661_v0  ;;  %v528_v4 = vld [vmem:[#allocation5 + $0x20] sm:$0xff]   ;;  %v529_v5 = vld [vmem:[#allocation5 + $0x18] sm:$0xff]   ;;  %s200_s22 = scalar_lea.vmem [#allocation7], %s419_s21  ;;  %s814_s29 = scalar_lea.hbm %s854_s3, %s432_s17 }
  0x4a   : > { %445 = vmatpush3.bf16.msra.mxu0 %v525_v1  ;;  %v530_v6 = vld [vmem:[#allocation5 + $0x10] sm:$0xff]   ;;  %v531_v7 = vld [vmem:[#allocation5 + $0x8] sm:$0xff]   ;;  %v532_v8 = vld [vmem:[#allocation5] sm:$0xff]   ;;  %s332_s23 = sshll.u32 %s200_s22, 4  ;;  %s319_s30 = scalar_lea.sflag [#allocation4], %s791_s11  ;;  %s333_s23 = int_to_ptr.vmem [resolvable:$true] %s332_s23 }
  0x4b   : > { %446 = vmatprep.subr.bf16.mxu0 %v661_v0  ;;  %v202_v9 = vld [vmem:[%s174_s27] sm:$0xff]  ;;  %s587_s4 = scalar_lea.vmem %s333_s23, 128  ;;  %p870_p3 = scmp.ne.s32.totalorder %s864_s6, 0 }
  0x4c   : > { %v203_v10 = vpack.c.bf16 %v202_v9, %v202_v9  ;;  %v422_v11 = vld [vmem:[%s853_s2] ss:$0 sm:$0xff]  ;;  %p588_p8 = scmp.ne.s32.totalorder %s333_s23, %s587_s4  ;;  %s663_s16 = smov [#allocation7]  }
  0x4d   : > { %s591_s8 = sshll.u32 %s663_s16, 4  ;;  %s592_s8 = int_to_ptr.vmem [resolvable:$false] %s591_s8 }
  0x4e   : > { %447 = vmatpush3.bf16.msra.mxu0 %v526_v2  ;;  %p589_p11 = pnand %p588_p8, %p870_p3  ;;  %s593_s7 = scalar_lea.vmem %s592_s8, 256 }
  0x4f   : > { %448 = vmatprep.subr.bf16.mxu0 %v661_v0  ;;  %p594_p10 = scmp.lt.s32.totalorder %s333_s23, %s592_s8  ;;  %p595_p2 = scmp.lt.s32.totalorder %s593_s7, %s587_s4 }
  0x50   : > { %p590_p7 = pneg %p589_p11 }
  0x51   : > { %p596_p13 = por %p595_p2, %p594_p10 }
  0x52   : > { %449 = vmatpush3.bf16.msra.mxu0 %v527_v3 }
  0x53   : > { %450 = vmatprep.subr.bf16.mxu0 %v661_v0  ;;  %p597_p0 = pnand %p596_p13, %p590_p7 }
  0x56   : > { %451 = vmatpush3.bf16.msra.mxu0 %v528_v4 }
  0x57   : > { %452 = vmatprep.subr.bf16.mxu0 %v661_v0 }
  0x5a   : > { %453 = vmatpush3.bf16.msra.mxu0 %v529_v5 }
  0x5b   : > { %454 = vmatprep.subr.bf16.mxu0 %v661_v0 }
  0x5e   : > { %455 = vmatpush3.bf16.msra.mxu0 %v530_v6 }
  0x5f   : > { %456 = vmatprep.subr.bf16.mxu0 %v661_v0 }
  0x62   : > { %457 = vmatpush3.bf16.msra.mxu0 %v531_v7 }
  0x63   : > { %458 = vmatprep.subr.bf16.mxu0 %v661_v0 }
  0x66   : > { %459 = vmatpush3.bf16.msra.mxu0 %v532_v8 }
  0x69   : > { %461 = vmatmul.mubr.bf16.vlgmr.msra.gmra.mxu0 %v203_v10 }
 0x129   : > { %v309_v12 = vpop.f32.mrf.mxu0 }
 0x12a   : > { %v310_v13 = vadd.f32 %v422_v11, %v309_v12 }
 0x12b   : > { %v462_v14 = vpop.f32.mrf.mxu0 }
 0x12c   : > { %v315_v15 = vmul.f32 0.5, %v310_v13 }
 0x12d   : > { %v312_v16 = vpop.f32.mrf.mxu0 }
 0x12e   : > { %v316_v17 = vadd.f32 %v315_v15, %v202_v9 }
 0x12f   : > { %v463_v18 = vpop.f32.mrf.mxu0 }
 0x130   : > { %317 = vst [vmem:[%s200_s22] sm:$0xff] %v316_v17 }
 0x131   : > { %600 = shalt.err (!%p597_p0)
}
 0x132   : > { %s601_s9 = scalar_lea.hbm %s814_s29, 128  ;;  %s605_s21 = scalar_lea.hbm %s854_s3, 256 }
 0x133   : > { %p602_p5 = scmp.ne.s32.totalorder %s814_s29, %s601_s9  ;;  %p606_p1 = scmp.lt.s32.totalorder %s814_s29, %s854_s3 }
 0x134   : > { %p607_p4 = scmp.lt.s32.totalorder %s605_s21, %s601_s9 }
 0x135   : > { %p603_p9 = pnand %p602_p5, %p870_p3 }
 0x136   : > { %p608_p6 = por %p607_p4, %p606_p1 }
 0x137   : > { %p604_p12 = pneg %p603_p9 }
 0x139   : > { %p609_p8 = pnand %p608_p6, %p604_p12 }
 0x13b   : > { %612 = shalt.err (!%p609_p8)
}
 0x13c   : > { %470 = dma.vmem_to_hbm [thread:$0]  (%p870_p3), %s333_s23, 128, %s814_s29, %s319_s30  }
 0x13d PF: > { %s344_s18 = sand.u32 1, %s643_s12   ;;  %p871_p11 = scmp.ne.s32.totalorder %s860_s19, 0 }
 0x13e   : > { %p872_p7 = scmp.ge.s32.totalorder %s655_s15, 2  ;;  %s345_s20 = scalar_lea.sflag [#allocation4], %s344_s18 }
 0x140   : > { %p481_p10 = pnand %p872_p7, %p871_p11 }
 0x142   : > { %p482_p2 = pneg %p481_p10 }
 0x144   : > { %638 = dma.done.wait (%p482_p2), %s345_s20, 128  }
 0x145   : > { %640 = vsyncadd (%p482_p2), %s345_s20, 4294967168  ;;  %p17_p13 = scmp.ge.s32.totalorder %s738_s24, 4   ;;  %s873_s12 = smov %s647_s13 }
 0x146   : > { %s874_s13 = smov %s651_s14  ;;  %s875_s14 = smov %s755_s5 }
 0x147   : > { %s876_s15 = smov %s738_s24  ;;  %19 = sbr.rel (!%p17_p13) target bundleno = 6 (0x6), region = 81 }
 0x14c   :  { %350 = vsyncpa [#allocation3], 1 }
 0x14d   :  { %352 = vsyncpa [#allocation3 + $0x1], 1 }
 0x14e   :  { %353 = vsyncpa [#allocation6], 1 }
 0x14f   :  { %354 = vsyncpa [#allocation4], 1 }
 0x150   :  { %356 = vsyncpa [#allocation4 + $0x1], 1 }

</bundles_post_ra>
